<compile_context>
chip_gen: v7x
topology: tpu7x:2x2x1
jax: 0.10.0
libtpu: 0.0.40
codegen_flags: <defaults>
</compile_context>

<pallas_src>
import math

import jax
import jax.numpy as jnp
from jax import lax
from jax.experimental import pallas as pl
from jax.experimental.pallas import tpu as pltpu


# ----------------------------- config parsing ------------------------------

def parse_cfg(cfg, in_channels, out_channels):
    """Returns ([(fan_in, fan_out), ...], [gelu_after_layer_l, ...]) mirroring BuildMLPBlock."""
    dims = []
    acts = []
    c = in_channels
    for idx, item in enumerate(cfg):
        if isinstance(item, int):
            dims.append((c, item))
            # GELU follows this Linear iff the next cfg entry is a (string) activation
            acts.append(idx + 1 < len(cfg) and not isinstance(cfg[idx + 1], int))
            c = item
    dims.append((c, out_channels))
    acts.append(False)  # trailing Linear has no activation
    return dims, acts


def init_params(key, dims):
    """Deterministic parameter init (PyTorch-Linear-like uniform ranges).

    Weights in PyTorch layout (out_features, in_features); biases as (out_features, 1).
    """
    params = []
    for (fan_in, fan_out) in dims:
        key, kw, kb = jax.random.split(key, 3)
        bound = 1.0 / math.sqrt(fan_in)
        w = jax.random.uniform(kw, (fan_out, fan_in), jnp.float32, -bound, bound)
        b = jax.random.uniform(kb, (fan_out, 1), jnp.float32, -bound, bound)
        params.append((w, b))
    return params


def pack_params(params):
    """Pack all weights into one (L, max_out, max_in) slab and biases into (L, max_out, 1).

    Cuts 6 tiny prologue DMAs down to 2.  (In a real model, pack once at init.)
    """
    L = len(params)
    max_out = max(w.shape[0] for (w, _) in params)
    max_in = max(w.shape[1] for (w, _) in params)
    w_slab = jnp.zeros((L, max_out, max_in), jnp.float32)
    b_slab = jnp.zeros((L, max_out, 1), jnp.float32)
    for l, (w, b) in enumerate(params):
        w_slab = w_slab.at[l, : w.shape[0], : w.shape[1]].set(w.astype(jnp.float32))
        b_slab = b_slab.at[l, : b.shape[0], :].set(b.astype(jnp.float32))
    return w_slab, b_slab


# ------------------------------- GELU variants ------------------------------

def _gelu_exact(x):
    # exact GELU (erf-based), bit-faithful to torch.nn.GELU(approximate='none').
    # NOTE: lax.erf lowers to a long VPU polynomial — VALU-bound. Kept for parity only.
    return 0.5 * x * (1.0 + lax.erf(x * (1.0 / math.sqrt(2.0))))


def _gelu_tanh(x):
    # tanh approximation (torch.nn.GELU(approximate='tanh')).
    # jnp.tanh executes on the EUP — a separate VLIW slot — so it is nearly free here.
    c = math.sqrt(2.0 / math.pi)
    return 0.5 * x * (1.0 + jnp.tanh(c * (x + 0.044715 * (x * x * x))))


# ------------------------------- Pallas kernel ------------------------------

def make_mlp_kernel(layer_dims, act_flags, approximate_gelu):
    num_layers = len(layer_dims)
    gelu = _gelu_tanh if approximate_gelu else _gelu_exact

    def kernel(x_ref, w_ref, b_ref, o_ref):
        # x_ref: (tm, in_ch) natural row-major tile (no wrapper transpose).
        # Relayout once inside the kernel so the big row axis sits on the 128-lane
        # dim: all elementwise GELU work is then lane-dense.  This transpose lands
        # on the XLU slot, which is otherwise idle in this kernel.
        h = jnp.transpose(x_ref[...].astype(jnp.float32))            # (in_ch, tm)
        for l in range(num_layers):
            in_f, out_f = layer_dims[l]
            w = w_ref[l, :out_f, :in_f].astype(jnp.float32)          # (out_f, in_f), torch layout
            b = b_ref[l, :out_f, :].astype(jnp.float32)              # (out_f, 1) -> bcast over lanes
            # (out_f, in_f) @ (in_f, tm) -> (out_f, tm); f32 accumulation on the MXU.
            h = jnp.dot(w, h, preferred_element_type=jnp.float32) + b
            if act_flags[l]:
                h = gelu(h)
        # Back to natural layout for a contiguous (tm, out_ch) store in HBM.
        o_ref[...] = jnp.transpose(h).astype(o_ref.dtype)

    return kernel


def _choose_row_tile(M, tm):
    """Pick the row-tile size.

    - tiny problems: one block whose dims equal the array dims (no raggedness),
    - otherwise: a multiple of 128, capped at `tm`, sized so the grid has >= 2
      steps whenever possible (v7x shards the 'parallel' axis over 2 TensorCores).
    """
    if M <= 256:
        return M
    if M >= 2 * tm:
        return tm
    half = -(-M // 2)
    return max(128, ((half + 127) // 128) * 128)


def mlp_block_forward(x, params, act_flags, *, tm=4096, approximate_gelu=True):
    """Apply the fused MLP kernel to x of shape (..., in_channels)."""
    in_ch = x.shape[-1]
    out_ch = params[-1][0].shape[0]
    layer_dims = [(w.shape[1], w.shape[0]) for (w, _) in params]   # (fan_in, fan_out)
    lead_shape = x.shape[:-1]
    M = int(math.prod(lead_shape)) if lead_shape else 1

    # Natural HBM layout: no wrapper-side transpose (reshape is free).
    x2 = x.reshape(M, in_ch)
    # TODO(synk): if the surrounding model tolerates it, carry x/y as bf16 in HBM
    # (upcast to f32 in-kernel) to halve DMA traffic once memory-bound again.

    w_slab, b_slab = pack_params(params)
    L, max_out, max_in = w_slab.shape

    tm_eff = _choose_row_tile(M, tm)
    grid = (pl.cdiv(M, tm_eff),)   # ragged last block handled by Pallas store-masking

    kernel = make_mlp_kernel(layer_dims, act_flags, approximate_gelu)

    itemsize = x2.dtype.itemsize
    flops = 2 * M * sum(fi * fo for (fi, fo) in layer_dims)
    transcendentals = M * sum(fo for (fi, fo), a in zip(layer_dims, act_flags) if a)
    bytes_accessed = (M * in_ch * itemsize + M * out_ch * itemsize
                      + int(w_slab.size) * 4 + int(b_slab.size) * 4)

    y = pl.pallas_call(
        kernel,
        out_shape=jax.ShapeDtypeStruct((M, out_ch), x.dtype),
        grid=grid,
        in_specs=[
            pl.BlockSpec((tm_eff, in_ch), lambda i: (i, 0)),
            pl.BlockSpec((L, max_out, max_in), lambda i: (0, 0, 0)),  # resident weights
            pl.BlockSpec((L, max_out, 1), lambda i: (0, 0, 0)),       # resident biases
        ],
        out_specs=pl.BlockSpec((tm_eff, out_ch), lambda i: (i, 0)),
        compiler_params=pltpu.CompilerParams(
            dimension_semantics=("parallel",),
        ),
        cost_estimate=pl.CostEstimate(
            flops=int(flops),
            transcendentals=int(transcendentals),
            bytes_accessed=int(bytes_accessed),
        ),
    )(x2, w_slab, b_slab)

    return y.reshape(*lead_shape, out_ch)


# ------------------------------ pure-JAX reference ---------------------------

def mlp_block_reference(x, params, act_flags, *, approximate_gelu=False):
    gelu = _gelu_tanh if approximate_gelu else _gelu_exact
    h = x.astype(jnp.float32)
    for l, (w, b) in enumerate(params):
        h = h @ w.T + b[:, 0]                  # PyTorch: x @ W^T + b
        if act_flags[l]:
            h = gelu(h)
    return h.astype(x.dtype)


# ----------------------------------- main ------------------------------------

if __name__ == "__main__":
    # MLPBlock(cfg=[32, "GELU", 32, "GELU"], in_channels=16, out_channels=16)
    cfg = [32, "GELU", 32, "GELU"]
    in_channels, out_channels = 16, 16
    dims, act_flags = parse_cfg(cfg, in_channels, out_channels)

    key = jax.random.PRNGKey(0)
    key, kx, kx2, kx3 = jax.random.split(key, 4)
    params = init_params(key, dims)

    # --- small test: (2, 8, 16) -> single full block ---
    x = jax.random.normal(kx, (2, 8, in_channels), jnp.float32)

    # default (tanh-GELU) kernel vs matching reference
    y = jax.block_until_ready(mlp_block_forward(x, params, act_flags))
    y_ref_tanh = mlp_block_reference(x, params, act_flags, approximate_gelu=True)
    assert y.shape == (2, 8, out_channels)
    assert jnp.allclose(y, y_ref_tanh, atol=1e-5, rtol=1e-5), "mismatch (tanh GELU, small)"

    # exact-erf kernel path vs exact reference (bit-faithful to torch.nn.GELU default)
    y_exact = jax.block_until_ready(
        mlp_block_forward(x, params, act_flags, approximate_gelu=False))
    y_ref_exact = mlp_block_reference(x, params, act_flags, approximate_gelu=False)
    assert jnp.allclose(y_exact, y_ref_exact, atol=1e-5, rtol=1e-5), "mismatch (exact GELU)"

    # --- medium test: (4, 300, 16) -> 2-step grid with ragged last block ---
    x_mid = jax.random.normal(kx2, (4, 300, in_channels), jnp.float32)
    y_mid = jax.block_until_ready(mlp_block_forward(x_mid, params, act_flags))
    y_mid_ref = mlp_block_reference(x_mid, params, act_flags, approximate_gelu=True)
    assert y_mid.shape == (4, 300, out_channels)
    assert jnp.allclose(y_mid, y_mid_ref, atol=1e-5, rtol=1e-5), "mismatch (medium)"

    # --- larger test: (2, 4096, 16) -> M=8192, exercises full tm=4096 tiles, 2 steps ---
    x_big = jax.random.normal(kx3, (2, 4096, in_channels), jnp.float32)
    y_big = jax.block_until_ready(mlp_block_forward(x_big, params, act_flags))
    y_big_ref = mlp_block_reference(x_big, params, act_flags, approximate_gelu=True)
    assert y_big.shape == (2, 4096, out_channels)
    assert jnp.allclose(y_big, y_big_ref, atol=1e-5, rtol=1e-5), "mismatch (big)"

    print("KERNEL_OK")
</pallas_src>

<mosaic_0001>
module attributes {stable_mosaic.version = 11 : i64} {
  func.func @kernel(%arg0: i32, %arg1: memref<16x16xf32, #tpu.memory_space<vmem>>, %arg2: memref<3x32x32xf32, #tpu.memory_space<vmem>>, %arg3: memref<3x32x1xf32, #tpu.memory_space<vmem>>, %arg4: memref<16x16xf32, #tpu.memory_space<vmem>>) attributes {dimension_semantics = [#tpu.dimension_semantics<parallel>], iteration_bounds = array<i64: 1>, scalar_prefetch = 0 : i64, scratch_operands = 0 : i64, tpu.core_type = #tpu.core_type<tc>, window_params = [{transform_indices = @transform_0, window_bounds = array<i64: 16, 16>}, {pipeline_mode = #tpu.pipeline_mode<synchronous>, transform_indices = @transform_1, window_bounds = array<i64: 3, 32, 32>}, {pipeline_mode = #tpu.pipeline_mode<synchronous>, transform_indices = @transform_2, window_bounds = array<i64: 3, 32, 1>}, {transform_indices = @transform_3, window_bounds = array<i64: 16, 16>}]} {
    %c0 = arith.constant 0 : index
    %c0_0 = arith.constant 0 : index
    %0 = vector.load %arg1[%c0, %c0_0] : memref<16x16xf32, #tpu.memory_space<vmem>>, vector<16x16xf32>
    %1 = tpu.transpose %0, [1, 0] : vector<16x16xf32> -> vector<16x16xf32>
    %c0_1 = arith.constant 0 : index
    %c0_2 = arith.constant 0 : index
    %c0_3 = arith.constant 0 : index
    %2 = vector.load %arg2[%c0_1, %c0_2, %c0_3] : memref<3x32x32xf32, #tpu.memory_space<vmem>>, vector<1x32x16xf32>
    %3 = vector.shape_cast %2 : vector<1x32x16xf32> to vector<32x16xf32>
    %c0_4 = arith.constant 0 : index
    %c0_5 = arith.constant 0 : index
    %c0_6 = arith.constant 0 : index
    %4 = vector.load %arg3[%c0_4, %c0_5, %c0_6] : memref<3x32x1xf32, #tpu.memory_space<vmem>>, vector<1x32x1xf32>
    %5 = vector.shape_cast %4 : vector<1x32x1xf32> to vector<32x1xf32>
    %cst = arith.constant dense<0.000000e+00> : vector<32x16xf32>
    %6 = tpu.matmul %3, %1, %cst {dimension_numbers = #tpu.dot_dimension_numbers<[1], [0], [0], [1], [0, 0, 1, 1], [], []>} : vector<32x16xf32>, vector<16x16xf32>, vector<32x16xf32> -> vector<32x16xf32>
    %7 = vector.broadcast %5 : vector<32x1xf32> to vector<32x16xf32>
    %8 = arith.addf %6, %7 : vector<32x16xf32>
    %cst_7 = arith.constant 5.000000e-01 : f32
    %9 = vector.broadcast %cst_7 : f32 to vector<32x16xf32>
    %10 = arith.mulf %9, %8 : vector<32x16xf32>
    %11 = arith.mulf %8, %8 : vector<32x16xf32>
    %12 = arith.mulf %11, %8 : vector<32x16xf32>
    %cst_8 = arith.constant 4.471500e-02 : f32
    %13 = vector.broadcast %cst_8 : f32 to vector<32x16xf32>
    %14 = arith.mulf %13, %12 : vector<32x16xf32>
    %15 = arith.addf %8, %14 : vector<32x16xf32>
    %cst_9 = arith.constant 0.797884583 : f32
    %16 = vector.broadcast %cst_9 : f32 to vector<32x16xf32>
    %17 = arith.mulf %16, %15 : vector<32x16xf32>
    %18 = math.tanh %17 : vector<32x16xf32>
    %cst_10 = arith.constant 1.000000e+00 : f32
    %19 = vector.broadcast %cst_10 : f32 to vector<32x16xf32>
    %20 = arith.addf %19, %18 : vector<32x16xf32>
    %21 = arith.mulf %10, %20 : vector<32x16xf32>
    %c1 = arith.constant 1 : index
    %c0_11 = arith.constant 0 : index
    %c0_12 = arith.constant 0 : index
    %22 = vector.load %arg2[%c1, %c0_11, %c0_12] : memref<3x32x32xf32, #tpu.memory_space<vmem>>, vector<1x32x32xf32>
    %23 = vector.shape_cast %22 : vector<1x32x32xf32> to vector<32x32xf32>
    %c1_13 = arith.constant 1 : index
    %c0_14 = arith.constant 0 : index
    %c0_15 = arith.constant 0 : index
    %24 = vector.load %arg3[%c1_13, %c0_14, %c0_15] : memref<3x32x1xf32, #tpu.memory_space<vmem>>, vector<1x32x1xf32>
    %25 = vector.shape_cast %24 : vector<1x32x1xf32> to vector<32x1xf32>
    %cst_16 = arith.constant dense<0.000000e+00> : vector<32x16xf32>
    %26 = tpu.matmul %23, %21, %cst_16 {dimension_numbers = #tpu.dot_dimension_numbers<[1], [0], [0], [1], [0, 0, 1, 1], [], []>} : vector<32x32xf32>, vector<32x16xf32>, vector<32x16xf32> -> vector<32x16xf32>
    %27 = vector.broadcast %25 : vector<32x1xf32> to vector<32x16xf32>
    %28 = arith.addf %26, %27 : vector<32x16xf32>
    %cst_17 = arith.constant 5.000000e-01 : f32
    %29 = vector.broadcast %cst_17 : f32 to vector<32x16xf32>
    %30 = arith.mulf %29, %28 : vector<32x16xf32>
    %31 = arith.mulf %28, %28 : vector<32x16xf32>
    %32 = arith.mulf %31, %28 : vector<32x16xf32>
    %cst_18 = arith.constant 4.471500e-02 : f32
    %33 = vector.broadcast %cst_18 : f32 to vector<32x16xf32>
    %34 = arith.mulf %33, %32 : vector<32x16xf32>
    %35 = arith.addf %28, %34 : vector<32x16xf32>
    %cst_19 = arith.constant 0.797884583 : f32
    %36 = vector.broadcast %cst_19 : f32 to vector<32x16xf32>
    %37 = arith.mulf %36, %35 : vector<32x16xf32>
    %38 = math.tanh %37 : vector<32x16xf32>
    %cst_20 = arith.constant 1.000000e+00 : f32
    %39 = vector.broadcast %cst_20 : f32 to vector<32x16xf32>
    %40 = arith.addf %39, %38 : vector<32x16xf32>
    %41 = arith.mulf %30, %40 : vector<32x16xf32>
    %c2 = arith.constant 2 : index
    %c0_21 = arith.constant 0 : index
    %c0_22 = arith.constant 0 : index
    %42 = vector.load %arg2[%c2, %c0_21, %c0_22] : memref<3x32x32xf32, #tpu.memory_space<vmem>>, vector<1x16x32xf32>
    %43 = vector.shape_cast %42 : vector<1x16x32xf32> to vector<16x32xf32>
    %c2_23 = arith.constant 2 : index
    %c0_24 = arith.constant 0 : index
    %c0_25 = arith.constant 0 : index
    %44 = vector.load %arg3[%c2_23, %c0_24, %c0_25] : memref<3x32x1xf32, #tpu.memory_space<vmem>>, vector<1x16x1xf32>
    %45 = vector.shape_cast %44 : vector<1x16x1xf32> to vector<16x1xf32>
    %cst_26 = arith.constant dense<0.000000e+00> : vector<16x16xf32>
    %46 = tpu.matmul %43, %41, %cst_26 {dimension_numbers = #tpu.dot_dimension_numbers<[1], [0], [0], [1], [0, 0, 1, 1], [], []>} : vector<16x32xf32>, vector<32x16xf32>, vector<16x16xf32> -> vector<16x16xf32>
    %47 = vector.broadcast %45 : vector<16x1xf32> to vector<16x16xf32>
    %48 = arith.addf %46, %47 : vector<16x16xf32>
    %49 = tpu.transpose %48, [1, 0] : vector<16x16xf32> -> vector<16x16xf32>
    %c0_27 = arith.constant 0 : index
    %c0_28 = arith.constant 0 : index
    %50 = vector.load %arg4[%c0_27, %c0_28] : memref<16x16xf32, #tpu.memory_space<vmem>>, vector<16x16xf32>
    tpu.vector_store %arg4[%c0_27, %c0_28], %49 {strides = array<i32>} : memref<16x16xf32, #tpu.memory_space<vmem>>, vector<16x16xf32>,
    return
  }
  func.func @transform_0(%arg0: i32) -> (i32, i32) {
    %c0_i32 = arith.constant 0 : i32
    %c0_i32_0 = arith.constant 0 : i32
    return %arg0, %c0_i32 : i32, i32
  }
  func.func @transform_1(%arg0: i32) -> (i32, i32, i32) {
    %c0_i32 = arith.constant 0 : i32
    %c0_i32_0 = arith.constant 0 : i32
    %c0_i32_1 = arith.constant 0 : i32
    %c0_i32_2 = arith.constant 0 : i32
    return %c0_i32, %c0_i32_0, %c0_i32_1 : i32, i32, i32
  }
  func.func @transform_2(%arg0: i32) -> (i32, i32, i32) {
    %c0_i32 = arith.constant 0 : i32
    %c0_i32_0 = arith.constant 0 : i32
    %c0_i32_1 = arith.constant 0 : i32
    %c0_i32_2 = arith.constant 0 : i32
    return %c0_i32, %c0_i32_0, %c0_i32_1 : i32, i32, i32
  }
  func.func @transform_3(%arg0: i32) -> (i32, i32) {
    %c0_i32 = arith.constant 0 : i32
    %c0_i32_0 = arith.constant 0 : i32
    return %arg0, %c0_i32 : i32, i32
  }
}

</mosaic_0001>

<bundles_post_ra>
// kernel: tpu_custom_call.1
= control target key start
LH: loop header
LB: loop body
LE: loop exit
PB: predicated region body
PF: predicated region fallthrough
CT: control target
= control target key end

     0   :  { %8 = vsyncpa [#allocation3], 0  ;;  %s813_s0 = inlined_call_operand.hbm [shape: f32[16,16], index: 0, kind: input, shape index: {}]   ;;  %s814_s1 = inlined_call_operand.vmem [shape: f32[3,32,32], index: 1, kind: input, shape index: {}]   ;;  %s815_s2 = inlined_call_operand.vmem [shape: f32[3,32,1], index: 2, kind: input, shape index: {}]   ;;  %s816_s3 = inlined_call_operand.hbm [shape: f32[16,16], index: 3, kind: output, shape index: {}]  }
   0x1   :  { %9 = vsyncpa [#allocation4], 0  ;;  %s684_s12 = smov [#allocation2]   ;;  %s636_s16 = scalar_lea.hbm %s813_s0, 256 }
   0x2   :  { %s15_s13 = sshll.u32 %s684_s12, 4  ;;  %p637_p0 = scmp.ne.s32.totalorder %s813_s0, %s636_s16  ;;  %s16_s13 = int_to_ptr.vmem [resolvable:$true] %s15_s13 }
   0x3   :  { %p640_p1 = scmp.lt.u32.totalorder %s636_s16, %s813_s0 }
   0x5   :  { %p642_p2 = pnand %p640_p1, %p637_p0 }
   0x7   :  { %645 = shalt.err (!%p642_p2)
}
   0x8   :  { %s646_s21 = scalar_lea.vmem %s16_s13, 256  ;;  %p651_p4 = scmp.lt.s32.totalorder %s16_s13, %s16_s13 }
   0x9   :  { %p647_p3 = scmp.ne.s32.totalorder %s16_s13, %s646_s21  ;;  %p652_p5 = scmp.lt.s32.totalorder %s646_s21, %s646_s21 }
   0xb   :  { %p653_p6 = por %p652_p5, %p651_p4 }
   0xd   :  { %p654_p7 = pnand %p653_p6, %p647_p3 }
   0xf   :  { %657 = shalt.err (!%p654_p7)
}
  0x10   :  { %s685_s22 = smov 128   ;;  %s686_s23 = smov 8  }
  0x11   :  { %21 = dma.hbm_to_vmem [thread:$0]  %s813_s0, 256, %s16_s13, [#allocation3], %s685_s22, %s685_s22, %s686_s23  }
  0x12   :  { %680 = dma.done.wait [#allocation3], 256  }
  0x13   :  { %681 = vsyncadd [#allocation3], 4294967040  ;;  %v687_v0 = vmov 0   ;;  %vm59_vm0 = vcmask 130048   ;;  %v29_v1 = vld [vmem:[#allocation2] sm:$0xff]  ;;  %v30_v2 = vld [vmem:[#allocation2 + $0x8] sm:$0xff] }
  0x14   :  { %618 = vset.pattern.permute.xlu0 %v687_v0  ;;  %619 = vset.pattern.permute.xlu1 %v687_v0  ;;  %vm591_vm1 = vmpackc.low %vm59_vm0, %vm59_vm0  ;;  %v31_v3 = vld [vmem:[%s814_s1] sm:$0xff]  ;;  %v590_v4 = vpack.c.bf16 %v30_v2, %v29_v1  ;;  %v37_v6 = vld [vmem:[%s815_s2 + $0x10] sm:$0xff]  ;;  %vm229_vm2 = vcmask 261120   ;;  %s688_s11 = smov [#allocation5]  }
  0x15   :  { %559 = vmatprep.mubr.msk.f32.mxu0 %vm59_vm0, %v31_v3  ;;  %v35_v5 = vld [vmem:[%s815_s2] sm:$0xff]  ;;  %51 = vperm.xlu1 %619, %v37_v6   ;;  %v36_v7 = vld [vmem:[%s815_s2 + $0x8] sm:$0xff]  ;;  %v38_v8 = vld [vmem:[%s815_s2 + $0x18] sm:$0xff]  ;;  %s499_s12 = sshll.u32 %s688_s11, 4  ;;  %s500_s12 = int_to_ptr.vmem [resolvable:$true] %s499_s12 }
  0x16   :  { %592 = vmatprep.subr.msk.bf16.mxu0 %vm591_vm1, %v590_v4  ;;  %41 = vperm.xlu0 %618, %v35_v5   ;;  %v32_v9 = vld [vmem:[%s814_s1 + $0x8] sm:$0xff]  ;;  %v521_v10 = vld [vmem:[%s815_s2 + $0x20] sm:$0xff]  ;;  %v33_v11 = vld [vmem:[%s814_s1 + $0x10] sm:$0xff]  ;;  %p663_p9 = scmp.lt.s32.totalorder %s500_s12, %s500_s12 }
  0x17   :  { %595 = vmatpush3.bf16.xpose.msk.msra.mxu0 %vm591_vm1, %v590_v4  ;;  %v522_v12 = vld [vmem:[%s815_s2 + $0x28] sm:$0xff]  ;;  %v34_v13 = vld [vmem:[%s814_s1 + $0x18] sm:$0xff]  ;;  %v523_v14 = vld [vmem:[%s815_s2 + $0x30] sm:$0xff] }
  0x18   :  { %v524_v15 = vld [vmem:[%s815_s2 + $0x38] sm:$0xff]  ;;  %v531_v16 = vld [vmem:[%s815_s2 + $0x40] sm:$0xff]  ;;  %v532_v17 = vld [vmem:[%s815_s2 + $0x48] sm:$0xff] }
  0x19   :  { %56 = vperm.xlu1 %619, %v38_v8   ;;  %v517_v18 = vld [vmem:[%s814_s1 + $0x20] sm:$0xff]  ;;  %v518_v5 = vld [vmem:[%s814_s1 + $0x28] sm:$0xff]  ;;  %v519_v6 = vld [vmem:[%s814_s1 + $0x30] sm:$0xff] }
  0x1a   :  { %46 = vperm.xlu0 %618, %v36_v7   ;;  %573 = vmatprep.mubr.msk.f32.mxu1 %vm229_vm2, %v517_v18  ;;  %v520_v7 = vld [vmem:[%s814_s1 + $0x38] sm:$0xff]  ;;  %v529_v8 = vld [vmem:[%s814_s1 + $0x40] sm:$0xff] }
  0x1d   :  { %216 = vperm.xlu1 %619, %v522_v12  }
  0x1e   :  { %560 = vmatmul.mubr.msk.f32.vlgmr.msra.gmra.mrb[0].mxu0 %vm59_vm0, %v32_v9  ;;  %211 = vperm.xlu0 %618, %v521_v10  }
  0x1f   :  { %562 = vmatprep.mubr.msk.f32.mxu0 %vm59_vm0, %v33_v11 }
  0x21   :  { %226 = vperm.xlu1 %619, %v524_v15  }
  0x22   :  { %563 = vmatmul.mubr.msk.f32.gmra.mrb[2].mxu0 %vm59_vm0, %v34_v13  ;;  %221 = vperm.xlu0 %618, %v523_v14  }
  0x23   :  { %587 = vmatprep.mubr.msk.f32.mxu0 %vm229_vm2, %v529_v8 }
  0x25   :  { %376 = vperm.xlu1 %619, %v532_v17  }
  0x26   :  { %371 = vperm.xlu0 %618, %v531_v16  }
  0x94   :  { %v52_v20 = vpop.permute.xlu1 %51 }
  0x95   :  { %v42_v19 = vpop.permute.xlu0 %41 }
  0x98   :  { %v57_v27 = vpop.permute.xlu1 %56 }
  0x99   :  { %v47_v21 = vpop.permute.xlu0 %46 }
  0x9c   :  { %v217_v9 = vpop.permute.xlu1 %216 }
  0x9d   :  { %v212_v10 = vpop.permute.xlu0 %211 }
  0xa0   :  { %v227_v16 = vpop.permute.xlu1 %226 }
  0xf1   :  { %v561_v22 = vpop.f32.mrb[0].mxu0 }
  0xf2   :  { %v150_v23 = vadd.f32 %v561_v22, %v47_v21  ;;  %v144_v24 = vpop.f32.mrb[1].mxu0 }
  0xf3   :  { %v145_v25 = vadd.f32 %v144_v24, %v42_v19  ;;  %v222_v19 = vpop.permute.xlu0 %221 }
  0xf4   :  { %v168_v26 = vmul.f32 %v150_v23, %v150_v23  ;;  %v164_v53 = vmul.f32 0.5, %v150_v23 }
  0xf5   :  { %v167_v28 = vmul.f32 %v145_v25, %v145_v25  ;;  %v564_v29 = vpop.f32.mrb[2].mxu0  ;;  %v163_v55 = vmul.f32 0.5, %v145_v25 }
  0xf6   :  { %v172_v30 = vmul.f32 %v168_v26, %v150_v23  ;;  %v160_v31 = vadd.f32 %v564_v29, %v57_v27  ;;  %v154_v32 = vpop.f32.mrb[3].mxu0 }
  0xf7   :  { %v171_v33 = vmul.f32 %v167_v28, %v145_v25  ;;  %v155_v34 = vadd.f32 %v154_v32, %v52_v20 }
  0xf8   :  { %v176_v35 = vmul.f32 0.044715, %v172_v30  ;;  %v170_v36 = vmul.f32 %v160_v31, %v160_v31  ;;  %v166_v61 = vmul.f32 0.5, %v160_v31 }
  0xf9   :  { %v175_v37 = vmul.f32 0.044715, %v171_v33  ;;  %v169_v38 = vmul.f32 %v155_v34, %v155_v34  ;;  %v165_v0 = vmul.f32 0.5, %v155_v34 }
  0xfa   :  { %v180_v39 = vadd.f32 %v176_v35, %v150_v23  ;;  %v174_v40 = vmul.f32 %v170_v36, %v160_v31 }
  0xfb   :  { %v179_v41 = vadd.f32 %v175_v37, %v145_v25  ;;  %v173_v42 = vmul.f32 %v169_v38, %v155_v34 }
  0xfc   :  { %v178_v43 = vmul.f32 0.044715, %v174_v40  ;;  %v184_v44 = vmul.f32 0.7978846, %v180_v39 }
  0xfd   :  { %v177_v45 = vmul.f32 0.044715, %v173_v42  ;;  %v183_v46 = vmul.f32 0.7978846, %v179_v41 }
  0xfe   :  { %v182_v47 = vadd.f32 %v178_v43, %v160_v31  ;;  %620 = vtanh.f32 %v184_v44 }
  0xff   :  { %v181_v48 = vadd.f32 %v177_v45, %v155_v34  ;;  %622 = vtanh.f32 %v183_v46 }
 0x100   :  { %v186_v49 = vmul.f32 0.7978846, %v182_v47 }
 0x101   :  { %v185_v50 = vmul.f32 0.7978846, %v181_v48 }
 0x102   :  { %624 = vtanh.f32 %v186_v49 }
 0x103   :  { %626 = vtanh.f32 %v185_v50 }
 0x108   :  { %v621_v51 = vpop.eup %620 }
 0x109   :  { %v623_v52 = vpop.eup %622  ;;  %v192_v54 = vadd.f32 1.0, %v621_v51 }
 0x10a   :  { %v191_v56 = vadd.f32 1.0, %v623_v52 }
 0x10b   :  { %v196_v57 = vmul.f32 %v192_v54, %v164_v53 }
 0x10c   :  { %v625_v58 = vpop.eup %624  ;;  %v195_v59 = vmul.f32 %v191_v56, %v163_v55 }
 0x10d   :  { %v627_v60 = vpop.eup %626  ;;  %v194_v62 = vadd.f32 1.0, %v625_v58 }
 0x10e   :  { %v596_v63 = vpack.c.bf16 %v196_v57, %v195_v59  ;;  %v193_v1 = vadd.f32 1.0, %v627_v60  ;;  %v530_v59 = vld [vmem:[%s814_s1 + $0x48] sm:$0xff]  ;;  %s658_s1 = scalar_lea.vmem %s500_s12, 256 }
 0x10f   :  { %v198_v2 = vmul.f32 %v194_v62, %v166_v61  ;;  %v372_v61 = vpop.permute.xlu0 %371  ;;  %p659_p8 = scmp.ne.s32.totalorder %s500_s12, %s658_s1  ;;  %p664_p10 = scmp.lt.s32.totalorder %s658_s1, %s658_s1 }
 0x110   :  { %597 = vmatprep.subr.bf16.mxu1 %v596_v63  ;;  %v197_v3 = vmul.f32 %v193_v1, %v165_v0  ;;  %v377_v0 = vpop.permute.xlu1 %376 }
 0x111   :  { %599 = vmatpush3.bf16.msra.mxu1 %v596_v63  ;;  %p665_p11 = por %p664_p10, %p663_p9 }
 0x112   :  { %v600_v4 = vpack.c.bf16 %v198_v2, %v197_v3 }
 0x113   :  { %p666_p12 = pnand %p665_p11, %p659_p8 }
 0x114   :  { %601 = vmatprep.subr.bf16.mxu1 %v600_v4 }
 0x115   :  { %603 = vmatpush3.bf16.msra.mxu1 %v600_v4 }
 0x118   :  { %574 = vmatmul.mubr.msk.f32.vlgmr.msra.gmra.mrb[0].mxu1 %vm229_vm2, %v518_v5 }
 0x119   :  { %576 = vmatprep.mubr.msk.f32.mxu1 %vm229_vm2, %v519_v6 }
 0x11c   :  { %577 = vmatmul.mubr.msk.f32.gmra.mrb[2].mxu1 %vm229_vm2, %v520_v7 }
 0x1eb   :  { %v575_v11 = vpop.f32.mrb[0].mxu1 }
 0x1ec   :  { %v314_v12 = vadd.f32 %v575_v11, %v217_v9  ;;  %v308_v13 = vpop.f32.mrb[1].mxu1 }
 0x1ed   :  { %v309_v14 = vadd.f32 %v308_v13, %v212_v10 }
 0x1ee   :  { %v332_v15 = vmul.f32 %v314_v12, %v314_v12  ;;  %v328_v43 = vmul.f32 0.5, %v314_v12 }
 0x1ef   :  { %v331_v17 = vmul.f32 %v309_v14, %v309_v14  ;;  %v578_v18 = vpop.f32.mrb[2].mxu1  ;;  %v327_v45 = vmul.f32 0.5, %v309_v14 }
 0x1f0   :  { %v336_v20 = vmul.f32 %v332_v15, %v314_v12  ;;  %v324_v21 = vadd.f32 %v578_v18, %v227_v16  ;;  %v318_v22 = vpop.f32.mrb[3].mxu1 }
 0x1f1   :  { %v335_v23 = vmul.f32 %v331_v17, %v309_v14  ;;  %v319_v24 = vadd.f32 %v318_v22, %v222_v19 }
 0x1f2   :  { %v340_v25 = vmul.f32 0.044715, %v336_v20  ;;  %v334_v26 = vmul.f32 %v324_v21, %v324_v21  ;;  %v330_v51 = vmul.f32 0.5, %v324_v21 }
 0x1f3   :  { %v339_v27 = vmul.f32 0.044715, %v335_v23  ;;  %v333_v28 = vmul.f32 %v319_v24, %v319_v24  ;;  %v329_v54 = vmul.f32 0.5, %v319_v24 }
 0x1f4   :  { %v344_v29 = vadd.f32 %v340_v25, %v314_v12  ;;  %v338_v30 = vmul.f32 %v334_v26, %v324_v21 }
 0x1f5   :  { %v343_v31 = vadd.f32 %v339_v27, %v309_v14  ;;  %v337_v32 = vmul.f32 %v333_v28, %v319_v24 }
 0x1f6   :  { %v348_v33 = vmul.f32 0.7978846, %v344_v29  ;;  %v342_v34 = vmul.f32 0.044715, %v338_v30 }
 0x1f7   :  { %v347_v35 = vmul.f32 0.7978846, %v343_v31  ;;  %v341_v36 = vmul.f32 0.044715, %v337_v32 }
 0x1f8   :  { %628 = vtanh.f32 %v348_v33  ;;  %v346_v37 = vadd.f32 %v342_v34, %v324_v21 }
 0x1f9   :  { %630 = vtanh.f32 %v347_v35  ;;  %v345_v38 = vadd.f32 %v341_v36, %v319_v24 }
 0x1fa   :  { %v350_v39 = vmul.f32 0.7978846, %v346_v37 }
 0x1fb   :  { %v349_v40 = vmul.f32 0.7978846, %v345_v38 }
 0x1fc   :  { %632 = vtanh.f32 %v350_v39 }
 0x1fd   :  { %634 = vtanh.f32 %v349_v40 }
 0x202   :  { %v629_v41 = vpop.eup %628 }
 0x203   :  { %v631_v42 = vpop.eup %630  ;;  %v356_v44 = vadd.f32 1.0, %v629_v41 }
 0x204   :  { %v355_v46 = vadd.f32 1.0, %v631_v42 }
 0x205   :  { %v360_v47 = vmul.f32 %v356_v44, %v328_v43 }
 0x206   :  { %v633_v48 = vpop.eup %632  ;;  %v359_v49 = vmul.f32 %v355_v46, %v327_v45 }
 0x207   :  { %v635_v50 = vpop.eup %634  ;;  %v358_v52 = vadd.f32 1.0, %v633_v48 }
 0x208   :  { %v604_v53 = vpack.c.bf16 %v360_v47, %v359_v49  ;;  %v357_v55 = vadd.f32 1.0, %v635_v50 }
 0x209   :  { %v362_v56 = vmul.f32 %v358_v52, %v330_v51 }
 0x20a   :  { %605 = vmatprep.subr.bf16.mxu0 %v604_v53  ;;  %v361_v57 = vmul.f32 %v357_v55, %v329_v54 }
 0x20b   :  { %607 = vmatpush3.bf16.msra.mxu0 %v604_v53 }
 0x20c   :  { %v608_v58 = vpack.c.bf16 %v362_v56, %v361_v57 }
 0x20e   :  { %609 = vmatprep.subr.bf16.mxu0 %v608_v58 }
 0x20f   :  { %611 = vmatpush3.bf16.msra.mxu0 %v608_v58 }
 0x212   :  { %588 = vmatmul.mubr.msk.f32.vlgmr.msra.gmra.mrb[4].mxu0 %vm229_vm2, %v530_v59 }
 0x2e5   :  { %v589_v60 = vpop.f32.mrb[4].mxu0 }
 0x2e6   :  { %v451_v62 = vpop.f32.mrb[5].mxu0  ;;  %v457_v1 = vadd.f32 %v589_v60, %v377_v0 }
 0x2e7   :  { %v452_v63 = vadd.f32 %v451_v62, %v372_v61 }
 0x2e9   :  { %460 = vxpose.xlu0.b32.start [1/2] (short) (narrow) %v452_v63, 16 }
 0x2ed   :  { %461 = vxpose.xlu0.b32.end [2/2] (short) (narrow) %v457_v1, 16 }
 0x369   :  { %v476_v2 = vpop.trf.xlu0 }
 0x36a   :  { %492 = vst.msk [vmem:[#allocation5] sm:$0xff] %vm59_vm0, %v476_v2 }
 0x36d   :  { %v477_v3 = vpop.trf.xlu0 }
 0x36e   :  { %493 = vst.msk [vmem:[#allocation5 + $0x8] sm:$0xff] %vm59_vm0, %v477_v3 }
 0x36f   :  { %669 = shalt.err (!%p666_p12)
}
 0x370   :  { %s670_s15 = scalar_lea.hbm %s816_s3, 256 }
 0x371   :  { %p671_p13 = scmp.ne.s32.totalorder %s816_s3, %s670_s15  ;;  %p674_p0 = scmp.lt.u32.totalorder %s670_s15, %s816_s3 }
 0x373   :  { %p676_p1 = pnand %p674_p0, %p671_p13 }
 0x375   :  { %679 = shalt.err (!%p676_p1)
}
 0x376   :  { %505 = dma.vmem_to_hbm [thread:$0]  %s500_s12, 256, %s816_s3, [#allocation4], %s685_s22, %s685_s22, %s686_s23  }
 0x377   :  { %682 = dma.done.wait [#allocation4], 256  }
 0x378   :  { %683 = vsyncadd [#allocation4], 4294967040 }
 0x379   :  { %509 = vsyncpa [#allocation3], 1 }
 0x37a   :  { %510 = vsyncpa [#allocation4], 1 }

</bundles_post_ra>
